<compile_context>
chip_gen: v7x
topology: tpu7x:2x2x1
jax: 0.10.0
libtpu: 0.0.40
codegen_flags: <defaults>
</compile_context>

<pallas_src>
import functools

import jax
import jax.numpy as jnp
from jax.experimental import pallas as pl
from jax.experimental.pallas import tpu as pltpu


def _round_up(v, m):
    return (v + m - 1) // m * m


def _cdiv(a, b):
    return (a + b - 1) // b


def _mlp_kernel(x_ref, w1_ref, b1_ref, w2_ref, b2_ref, o_ref, xpad_ref, *,
                n_feature, n_output):
    # Stage the narrow (tn, F) input block into a lane-dense (tn, Fp) f32 scratch.
    # Zeroing every step (not only on step 0) keeps this correct when the "parallel"
    # batch axis is sharded across TensorCores (v7x) -- each core has its own scratch.
    # One (tn, 128) worth of VPU zero-stores is noise next to the DMAs.
    xpad_ref[...] = jnp.zeros_like(xpad_ref)
    xpad_ref[:, :n_feature] = x_ref[...].astype(xpad_ref.dtype)

    # Layer 1: bf16 MXU matmul, f32 accumulation; bias + ReLU on the f32 value (VPU).
    h = jnp.dot(xpad_ref[...].astype(w1_ref.dtype), w1_ref[...],
                preferred_element_type=jnp.float32)
    h = jnp.maximum(h + b1_ref[...], 0.0)

    # Layer 2: cast activations to bf16 for the MXU, accumulate in f32, add bias.
    y = jnp.dot(h.astype(w2_ref.dtype), w2_ref[...],
                preferred_element_type=jnp.float32)
    y = y + b2_ref[...]

    # Store only the real output lanes (masked vst on the (tn, n_output) block).
    o_ref[...] = y[:, :n_output].astype(o_ref.dtype)


def net_forward(x, w1, b1, w2, b2, *, tile_n=1024):
    """x: (N, F); w1: (H, F); b1: (1, H)/(H,); w2: (O, H); b2: (1, O)/(O,) -> (N, O).

    Weights come PyTorch-style (out_features, in_features); they are transposed,
    zero-padded and cast to bf16 once here so the kernel sees lane-dense (in, out) tiles.
    """
    n, f = x.shape
    h = w1.shape[0]
    o = w2.shape[0]

    f32 = jnp.float32
    bf16 = jnp.bfloat16

    # Lane-pad the contraction / hidden / output dims of the resident weights to 128.
    # TODO(synk): pad hp/op to 256 on v6e/v7x once the widths make this compute-bound
    # (256x256 MXU); irrelevant while HBM-bound at these widths.
    fp = _round_up(f, 128)
    hp = _round_up(h, 128)
    op = _round_up(o, 128)

    # Batch tiling: cap at tile_n, prefer >=2 grid steps so v7x's two TensorCores both
    # get work, and size the tile from cdiv(n, num_tiles) so last-tile waste is < 8 rows
    # per tile (Pallas drops out-of-bounds rows of the edge block on store).
    num_tiles = max(1, _cdiv(n, tile_n))
    if n > 8:
        num_tiles = max(num_tiles, 2)
    tn = _round_up(_cdiv(n, num_tiles), 8)
    grid = (_cdiv(n, tn),)

    # Zero padding is numerically exact: padded input lanes hit zero weight rows, padded
    # hidden lanes get zero bias -> ReLU(0) = 0 -> contribute nothing to layer 2, and
    # padded output lanes are never stored.
    w1t = jnp.zeros((fp, hp), bf16).at[:f, :h].set(w1.astype(bf16).T)
    w2t = jnp.zeros((hp, op), bf16).at[:h, :o].set(w2.astype(bf16).T)
    b1p = jnp.zeros((1, hp), f32).at[:, :h].set(jnp.reshape(b1, (1, h)).astype(f32))
    b2p = jnp.zeros((1, op), f32).at[:, :o].set(jnp.reshape(b2, (1, o)).astype(f32))

    kernel = functools.partial(_mlp_kernel, n_feature=f, n_output=o)

    # TODO(synk): for non-trivial widths on v7x (64 MiB VMEM) re-budget: if the bf16
    # resident weights exceed the scoped limit, add an "arbitrary" reduction axis over
    # H/F with an f32 VMEM accumulator and set vmem_limit_bytes explicitly.
    return pl.pallas_call(
        kernel,
        out_shape=jax.ShapeDtypeStruct((n, o), x.dtype),
        grid_spec=pltpu.PrefetchScalarGridSpec(
            num_scalar_prefetch=0,
            grid=grid,
            in_specs=[
                # x: batch-tiled, double-buffered; last dim == full array dim (no pad).
                pl.BlockSpec((tn, f), lambda i: (i, 0)),
                # Weights / biases: constant block index -> resident, single-buffered.
                pl.BlockSpec((fp, hp), lambda i: (0, 0), pipeline_mode=pl.Buffered(1)),
                pl.BlockSpec((1, hp), lambda i: (0, 0), pipeline_mode=pl.Buffered(1)),
                pl.BlockSpec((hp, op), lambda i: (0, 0), pipeline_mode=pl.Buffered(1)),
                pl.BlockSpec((1, op), lambda i: (0, 0), pipeline_mode=pl.Buffered(1)),
            ],
            # Output written directly at (N, O); edge-block rows beyond N are dropped.
            out_specs=pl.BlockSpec((tn, o), lambda i: (i, 0)),
            scratch_shapes=[pltpu.VMEM((tn, fp), f32)],  # lane-padded x staging tile
        ),
        compiler_params=pltpu.CompilerParams(
            dimension_semantics=("parallel",),
        ),
    )(x, w1t, b1p, w2t, b2p)


def init_params(key, n_feature, n_hidden, n_output):
    """Deterministic init mimicking nn.Linear's uniform(-1/sqrt(fan_in), 1/sqrt(fan_in))."""
    k1, k2, k3, k4 = jax.random.split(key, 4)
    s1 = 1.0 / jnp.sqrt(jnp.float32(n_feature))
    s2 = 1.0 / jnp.sqrt(jnp.float32(n_hidden))
    w1 = jax.random.uniform(k1, (n_hidden, n_feature), jnp.float32, -s1, s1)
    b1 = jax.random.uniform(k2, (1, n_hidden), jnp.float32, -s1, s1)
    w2 = jax.random.uniform(k3, (n_output, n_hidden), jnp.float32, -s2, s2)
    b2 = jax.random.uniform(k4, (1, n_output), jnp.float32, -s2, s2)
    return w1, b1, w2, b2


if __name__ == "__main__":
    # Shapes implied by the module: Net(n_feature=2, n_hidden=10, n_output=2) on two
    # Gaussian clusters of 2-feature rows (small version of the original 100+100).
    n_feature, n_hidden, n_output = 2, 10, 2
    batch = 20

    key = jax.random.PRNGKey(0)
    kx0, kx1, kp = jax.random.split(key, 3)

    x = jnp.concatenate(
        [
            2.0 + jax.random.normal(kx0, (batch // 2, n_feature), jnp.float32),
            -2.0 + jax.random.normal(kx1, (batch // 2, n_feature), jnp.float32),
        ],
        axis=0,
    )

    w1, b1, w2, b2 = init_params(kp, n_feature, n_hidden, n_output)

    out = net_forward(x, w1, b1, w2, b2)
    jax.block_until_ready(out)
    assert out.shape == (batch, n_output)

    # Reference with matching precision (bf16 MXU operands, f32 accumulation).
    bf16 = jnp.bfloat16
    h_ref = jnp.maximum(
        jnp.dot(x.astype(bf16), w1.T.astype(bf16),
                preferred_element_type=jnp.float32) + b1, 0.0)
    ref = jnp.dot(h_ref.astype(bf16), w2.T.astype(bf16),
                  preferred_element_type=jnp.float32) + b2
    assert jnp.allclose(out, ref, atol=1e-2, rtol=1e-2), (
        f"max abs err {jnp.max(jnp.abs(out - ref))}")

    print("KERNEL_OK")
</pallas_src>

<mosaic_0001>
module attributes {stable_mosaic.version = 11 : i64} {
  func.func @_mlp_kernel(%arg0: i32, %arg1: memref<16x2xf32, #tpu.memory_space<vmem>>, %arg2: memref<128x128xbf16, #tpu.memory_space<vmem>>, %arg3: memref<1x128xf32, #tpu.memory_space<vmem>>, %arg4: memref<128x128xbf16, #tpu.memory_space<vmem>>, %arg5: memref<1x128xf32, #tpu.memory_space<vmem>>, %arg6: memref<16x2xf32, #tpu.memory_space<vmem>>, %arg7: memref<16x128xf32, #tpu.memory_space<vmem>>) attributes {dimension_semantics = [#tpu.dimension_semantics<parallel>], iteration_bounds = array<i64: 2>, scalar_prefetch = 0 : i64, scratch_operands = 1 : i64, tpu.core_type = #tpu.core_type<tc>, window_params = [{transform_indices = @transform_0, window_bounds = array<i64: 16, 2>}, {pipeline_mode = #tpu.pipeline_mode<synchronous>, transform_indices = @transform_1, window_bounds = array<i64: 128, 128>}, {pipeline_mode = #tpu.pipeline_mode<synchronous>, transform_indices = @transform_2, window_bounds = array<i64: 1, 128>}, {pipeline_mode = #tpu.pipeline_mode<synchronous>, transform_indices = @transform_3, window_bounds = array<i64: 128, 128>}, {pipeline_mode = #tpu.pipeline_mode<synchronous>, transform_indices = @transform_4, window_bounds = array<i64: 1, 128>}, {transform_indices = @transform_5, window_bounds = array<i64: 16, 2>}]} {
    %cst = arith.constant 0.000000e+00 : f32
    %0 = vector.broadcast %cst : f32 to vector<16x128xf32>
    %c0 = arith.constant 0 : index
    %c0_0 = arith.constant 0 : index
    %1 = vector.load %arg7[%c0, %c0_0] : memref<16x128xf32, #tpu.memory_space<vmem>>, vector<16x128xf32>
    tpu.vector_store %arg7[%c0, %c0_0], %0 {strides = array<i32>} : memref<16x128xf32, #tpu.memory_space<vmem>>, vector<16x128xf32>,
    %c0_1 = arith.constant 0 : index
    %c0_2 = arith.constant 0 : index
    %2 = vector.load %arg1[%c0_1, %c0_2] : memref<16x2xf32, #tpu.memory_space<vmem>>, vector<16x2xf32>
    %c0_3 = arith.constant 0 : index
    %c0_4 = arith.constant 0 : index
    %3 = vector.load %arg7[%c0_3, %c0_4] : memref<16x128xf32, #tpu.memory_space<vmem>>, vector<16x2xf32>
    tpu.vector_store %arg7[%c0_3, %c0_4], %2 {strides = array<i32>} : memref<16x128xf32, #tpu.memory_space<vmem>>, vector<16x2xf32>,
    %c0_5 = arith.constant 0 : index
    %c0_6 = arith.constant 0 : index
    %4 = vector.load %arg7[%c0_5, %c0_6] : memref<16x128xf32, #tpu.memory_space<vmem>>, vector<16x128xf32>
    %5 = arith.truncf %4 : vector<16x128xf32> to vector<16x128xbf16>
    %c0_7 = arith.constant 0 : index
    %c0_8 = arith.constant 0 : index
    %6 = vector.load %arg2[%c0_7, %c0_8] : memref<128x128xbf16, #tpu.memory_space<vmem>>, vector<128x128xbf16>
    %cst_9 = arith.constant dense<0.000000e+00> : vector<16x128xf32>
    %7 = tpu.matmul %5, %6, %cst_9 {dimension_numbers = #tpu.dot_dimension_numbers<[1], [0], [0], [1], [0, 0, 1, 1], [], []>} : vector<16x128xbf16>, vector<128x128xbf16>, vector<16x128xf32> -> vector<16x128xf32>
    %c0_10 = arith.constant 0 : index
    %c0_11 = arith.constant 0 : index
    %8 = vector.load %arg3[%c0_10, %c0_11] : memref<1x128xf32, #tpu.memory_space<vmem>>, vector<1x128xf32>
    %9 = vector.broadcast %8 : vector<1x128xf32> to vector<16x128xf32>
    %10 = arith.addf %7, %9 : vector<16x128xf32>
    %cst_12 = arith.constant 0.000000e+00 : f32
    %11 = vector.broadcast %cst_12 : f32 to vector<16x128xf32>
    %12 = arith.maximumf %10, %11 : vector<16x128xf32>
    %13 = arith.truncf %12 : vector<16x128xf32> to vector<16x128xbf16>
    %c0_13 = arith.constant 0 : index
    %c0_14 = arith.constant 0 : index
    %14 = vector.load %arg4[%c0_13, %c0_14] : memref<128x128xbf16, #tpu.memory_space<vmem>>, vector<128x128xbf16>
    %cst_15 = arith.constant dense<0.000000e+00> : vector<16x128xf32>
    %15 = tpu.matmul %13, %14, %cst_15 {dimension_numbers = #tpu.dot_dimension_numbers<[1], [0], [0], [1], [0, 0, 1, 1], [], []>} : vector<16x128xbf16>, vector<128x128xbf16>, vector<16x128xf32> -> vector<16x128xf32>
    %c0_16 = arith.constant 0 : index
    %c0_17 = arith.constant 0 : index
    %16 = vector.load %arg5[%c0_16, %c0_17] : memref<1x128xf32, #tpu.memory_space<vmem>>, vector<1x128xf32>
    %17 = vector.broadcast %16 : vector<1x128xf32> to vector<16x128xf32>
    %18 = arith.addf %15, %17 : vector<16x128xf32>
    %19 = vector.extract_strided_slice %18 {offsets = [0, 0], sizes = [16, 2], strides = [1, 1]} : vector<16x128xf32> to vector<16x2xf32>
    %c0_18 = arith.constant 0 : index
    %c0_19 = arith.constant 0 : index
    %20 = vector.load %arg6[%c0_18, %c0_19] : memref<16x2xf32, #tpu.memory_space<vmem>>, vector<16x2xf32>
    tpu.vector_store %arg6[%c0_18, %c0_19], %19 {strides = array<i32>} : memref<16x2xf32, #tpu.memory_space<vmem>>, vector<16x2xf32>,
    return
  }
  func.func @transform_0(%arg0: i32) -> (i32, i32) {
    %c0_i32 = arith.constant 0 : i32
    %c0_i32_0 = arith.constant 0 : i32
    return %arg0, %c0_i32 : i32, i32
  }
  func.func @transform_1(%arg0: i32) -> (i32, i32) {
    %c0_i32 = arith.constant 0 : i32
    %c0_i32_0 = arith.constant 0 : i32
    %c0_i32_1 = arith.constant 0 : i32
    return %c0_i32, %c0_i32_0 : i32, i32
  }
  func.func @transform_2(%arg0: i32) -> (i32, i32) {
    %c0_i32 = arith.constant 0 : i32
    %c0_i32_0 = arith.constant 0 : i32
    %c0_i32_1 = arith.constant 0 : i32
    return %c0_i32, %c0_i32_0 : i32, i32
  }
  func.func @transform_3(%arg0: i32) -> (i32, i32) {
    %c0_i32 = arith.constant 0 : i32
    %c0_i32_0 = arith.constant 0 : i32
    %c0_i32_1 = arith.constant 0 : i32
    return %c0_i32, %c0_i32_0 : i32, i32
  }
  func.func @transform_4(%arg0: i32) -> (i32, i32) {
    %c0_i32 = arith.constant 0 : i32
    %c0_i32_0 = arith.constant 0 : i32
    %c0_i32_1 = arith.constant 0 : i32
    return %c0_i32, %c0_i32_0 : i32, i32
  }
  func.func @transform_5(%arg0: i32) -> (i32, i32) {
    %c0_i32 = arith.constant 0 : i32
    %c0_i32_0 = arith.constant 0 : i32
    return %arg0, %c0_i32 : i32, i32
  }
}

</mosaic_0001>

<bundles_post_ra>
// kernel: tpu_custom_call.1
= control target key start
LH: loop header
LB: loop body
LE: loop exit
PB: predicated region body
PF: predicated region fallthrough
CT: control target
= control target key end

     0   :  { %10 = vsyncpa [#allocation4], 0  ;;  %s1366_s0 = inlined_call_operand.vmem [shape: f32[20,2], index: 0, kind: input, shape index: {}]   ;;  %s1367_s1 = inlined_call_operand.hbm [shape: bf16[128,128], index: 1, kind: input, shape index: {}]   ;;  %s1368_s2 = inlined_call_operand.vmem [shape: f32[1,128], index: 2, kind: input, shape index: {}]   ;;  %s1369_s3 = inlined_call_operand.hbm [shape: bf16[128,128], index: 3, kind: input, shape index: {}]   ;;  %s1370_s4 = inlined_call_operand.vmem [shape: f32[1,128], index: 4, kind: input, shape index: {}]   ;;  %s1371_s5 = inlined_call_operand.vmem [shape: f32[20,2], index: 5, kind: output, shape index: {}]  }
   0x1   :  { %11 = vsyncpa [#allocation6], 0  ;;  %s1181_s18 = smov 0   ;;  %s1183_s19 = smov 0  }
   0x2   :  { %s1185_s20 = smov 0  }
   0x3 LB: > { %s1194_s21 = sadd.s32 4294967295, %s1111_s20   ;;  %s1196_s22 = sadd.s32 1, %s1111_s20   ;;  %s1111_s20 = sphi %s1185_s20, %s1385_s20   ;;  %s1107_s19 = sphi %s1183_s19, %s1384_s19   ;;  %s1103_s18 = sphi %s1181_s18, %s1383_s18  }
   0x4   : > { %s131_s23 = ssub.s32 %s1111_s20, %s1196_s22  ;;  %s134_s24 = sadd.s32 1, %s1107_s19 }
   0x5   : > { %p132_p0 = scmp.eq.s32.totalorder %s131_s23, 0  ;;  %p144_p1 = scmp.ne.s32.totalorder %s1107_s19, %s1103_s18 }
   0x6   : > { %p145_p2 = scmp.eq.s32.totalorder %s1194_s21, 1  ;;  %p758_p3 = scmp.ge.s32.totalorder %s1111_s20, 1 }
   0x7   : > { %s1204_s25 = scalar_select %p132_p0, %s1107_s19, %s134_s24  }
   0x8   : > { %p1206_p4 = por %p145_p2, %p144_p1  ;;  %p158_p5 = scmp.lt.s32.totalorder %s1111_s20, 3 }
   0x9   : > { %p1372_p6 = scmp.eq.s32.totalorder %s1194_s21, 0  ;;  %s1145_s28 = smov [#allocation3]  }
   0xa   : > { %s1374_s26 = scalar_select %p1206_p4, 1, 0 }
   0xb   : > { %p1211_p7 = pnand %p758_p3, %p158_p5  ;;  %s170_s29 = sshll.u32 %s1145_s28, 4  ;;  %s171_s29 = int_to_ptr.vmem [resolvable:$true] %s170_s29 }
   0xc   : > { %s1146_s6 = smov [#allocation5]   ;;  %s993_s10 = scalar_lea.hbm %s1367_s1, 1024 }
   0xd   : > { %s1375_s27 = scalar_select %p1211_p7, 1, 0 }
   0xe   : > { %p872_p8 = pneg %p1211_p7  ;;  %s186_s7 = sshll.u32 %s1146_s6, 4  ;;  %s1223_s7 = int_to_ptr.vmem [resolvable:$true] %s186_s7 }
   0xf   : > { %p994_p10 = scmp.ne.s32.totalorder %s1367_s1, %s993_s10  ;;  %p1000_p0 = scmp.lt.u32.totalorder %s993_s10, %s1367_s1 }
  0x10   : > { %p1219_p9 = pnand %p1372_p6, %p872_p8 }
  0x12   : > { %p995_p11 = pneg %p1219_p9 }
  0x14   : > { %p996_p12 = pnand %p995_p11, %p994_p10 }
  0x16   : > { %p997_p13 = pneg %p996_p12 }
  0x18   : > { %p1002_p1 = pnand %p1000_p0, %p997_p13 }
  0x1a   : > { %1005 = shalt.err (!%p1002_p1)
}
  0x1b   : > { %s1006_s15 = scalar_lea.vmem %s171_s29, 1024  ;;  %p1014_p8 = scmp.lt.s32.totalorder %s171_s29, %s171_s29 }
  0x1c   : > { %p1007_p2 = scmp.ne.s32.totalorder %s171_s29, %s1006_s15  ;;  %p1015_p6 = scmp.lt.s32.totalorder %s1006_s15, %s1006_s15 }
  0x1e   : > { %p1009_p3 = pnand %p1007_p2, %p995_p11  ;;  %p1016_p4 = por %p1015_p6, %p1014_p8 }
  0x20   : > { %p1010_p5 = pneg %p1009_p3 }
  0x22   : > { %p1017_p7 = pnand %p1016_p4, %p1010_p5 }
  0x24   : > { %1020 = shalt.err (!%p1017_p7)
}
  0x25   : > { %s1147_s16 = smov 64   ;;  %s1148_s17 = smov 4  }
  0x26   : > { %875 = dma.hbm_to_vmem [thread:$0]  (!%p1219_p9), %s1367_s1, 1024, %s171_s29, [#allocation4], %s1147_s16, %s1147_s16, %s1148_s17  }
  0x27   : > { %s1021_s6 = scalar_lea.hbm %s1369_s3, 1024 }
  0x28   : > { %p1022_p10 = scmp.ne.s32.totalorder %s1369_s3, %s1021_s6  ;;  %p1028_p7 = scmp.lt.u32.totalorder %s1021_s6, %s1369_s3 }
  0x2a   : > { %p1024_p4 = pnand %p1022_p10, %p995_p11 }
  0x2c   : > { %p1025_p6 = pneg %p1024_p4 }
  0x2e   : > { %p1030_p12 = pnand %p1028_p7, %p1025_p6 }
  0x30   : > { %1033 = shalt.err (!%p1030_p12)
}
  0x31   : > { %s1034_s29 = scalar_lea.vmem %s1223_s7, 1024  ;;  %p1042_p2 = scmp.lt.s32.totalorder %s1223_s7, %s1223_s7 }
  0x32   : > { %p1035_p13 = scmp.ne.s32.totalorder %s1223_s7, %s1034_s29  ;;  %p1043_p3 = scmp.lt.s32.totalorder %s1034_s29, %s1034_s29 }
  0x34   : > { %p1037_p0 = pnand %p1035_p13, %p995_p11  ;;  %p1044_p5 = por %p1043_p3, %p1042_p2 }
  0x36   : > { %p1038_p1 = pneg %p1037_p0 }
  0x38   : > { %p1045_p8 = pnand %p1044_p5, %p1038_p1 }
  0x3a   : > { %1048 = shalt.err (!%p1045_p8)
}
  0x3b   : > { %878 = dma.hbm_to_vmem [thread:$0]  (!%p1219_p9), %s1369_s3, 1024, %s1223_s7, [#allocation6], %s1147_s16, %s1147_s16, %s1148_s17  }
  0x3c   : > { %p1377_p10 = scmp.ne.s32.totalorder %s1375_s27, 0 }
  0x3d   : > { %p1378_p4 = scmp.eq.s32.totalorder (!%p1377_p10), %s1194_s21, 0 }
  0x3e   : > { %222 = sbr.rel (%p1377_p10) target bundleno = 593 (0x251), region = 40 }
  0x45   : > { %1094 = dma.done.wait (%p1378_p4), [#allocation4], 1024   ;;  %p1379_p11 = pmov %p1378_p4 }
  0x46   : > { %p1380_p6 = pmov %p1378_p4 }
  0x47   : > { %1096 = vsyncadd (%p1379_p11), [#allocation4], 4294966272 }
  0x48   : > { %1098 = dma.done.wait (%p1380_p6), [#allocation6], 1024   ;;  %p1381_p7 = pmov %p1378_p4 }
  0x49   : > { %s1283_s30 = sshll.u32 %s1194_s21, 1  ;;  %v1149_v0 = vmov 0.0   ;;  %vm1150_vm0 = vmmov 0   ;;  %v977_v1 = vld [vmem:[#allocation3] sm:$0xff]   ;;  %v978_v2 = vld [vmem:[#allocation3 + $0x8] sm:$0xff]   ;;  %v979_v3 = vld [vmem:[#allocation3 + $0x10] sm:$0xff]  }
  0x4a   : > { %1100 = vsyncadd (%p1381_p7), [#allocation6], 4294966272  ;;  %824 = vmatprep.subr.bf16.mxu0 %v1149_v0  ;;  %277 = vst [vmem:[#allocation2] sm:$0xff] %v1149_v0  ;;  %840 = vmatprep.mubr.msk.bf16.mxu0 %vm1150_vm0, %v1149_v0  ;;  %p262_p9 = scmp.lt.s32.totalorder %s1283_s30, 2  ;;  %vm281_vm1 = vcmask 15360   ;;  %v985_v6 = vld [vmem:[#allocation5] sm:$0xff]  }
  0x4b   : > { %278 = vst [vmem:[#allocation2 + $0x8] sm:$0xff] %v1149_v0  ;;  %844 = vmatprep.subr.bf16.mxu1 %v1149_v0  ;;  %860 = vmatprep.mubr.msk.bf16.mxu1 %vm1150_vm0, %v1149_v0  ;;  %v980_v7 = vld [vmem:[#allocation3 + $0x18] sm:$0xff]   ;;  %v986_v8 = vld [vmem:[#allocation5 + $0x8] sm:$0xff]   ;;  %v981_v9 = vld [vmem:[#allocation3 + $0x20] sm:$0xff]   ;;  %s254_s23 = sand.u32 1, %s1103_s18   ;;  %p1382_p12 = scmp.ne.s32.totalorder %s1374_s26, 0 }
  0x4c   : > { %s263_s27 = scalar_select %p262_p9, %s1283_s30, 2  ;;  %825 = vmatpush3.bf16.msra.mxu0 %v977_v1  ;;  %845 = vmatpush3.bf16.msra.mxu1 %v985_v6  ;;  %v987_v10 = vld [vmem:[#allocation5 + $0x10] sm:$0xff]   ;;  %v982_v11 = vld [vmem:[#allocation3 + $0x28] sm:$0xff]   ;;  %v988_v12 = vld [vmem:[#allocation5 + $0x18] sm:$0xff]  }
  0x4d   : > { %826 = vmatprep.subr.bf16.mxu0 %v1149_v0  ;;  %846 = vmatprep.subr.bf16.mxu1 %v1149_v0  ;;  %v983_v13 = vld [vmem:[#allocation3 + $0x30] sm:$0xff]   ;;  %v989_v14 = vld [vmem:[#allocation5 + $0x20] sm:$0xff]   ;;  %v984_v15 = vld [vmem:[#allocation3 + $0x38] sm:$0xff]   ;;  %s765_s24 = sshll.u32 %s254_s23, 4  ;;  %s524_s18 = ssub.s32 (%p1382_p12), 3, %s1283_s30 }
  0x4e   : > { %s767_s7 = sshll.u32 %s263_s27, 3  ;;  %v990_v18 = vld [vmem:[#allocation5 + $0x28] sm:$0xff]   ;;  %v991_v20 = vld [vmem:[#allocation5 + $0x30] sm:$0xff]   ;;  %v992_v21 = vld [vmem:[#allocation5 + $0x38] sm:$0xff]   ;;  %s1319_s8 = scalar_lea.vmem [#allocation7], %s765_s24  }
  0x4f   : > { %s265_s16 = scalar_lea.vmem %s1366_s0, %s767_s7  ;;  %v768_v22 = vld [vmem:[%s1368_s2] ss:$0 sm:$0xff]  ;;  %s803_s9 = sshll.u32 (%p1382_p12), %s1194_s21, 4 }
  0x50   : > { %827 = vmatpush3.bf16.msra.mxu0 %v978_v2  ;;  %v279_v4 = vld [vmem:[%s265_s16] sm:$0xff]  ;;  %v280_v5 = vld [vmem:[%s265_s16 + $0x8] sm:$0xff]  ;;  %847 = vmatpush3.bf16.msra.mxu1 %v986_v8  ;;  %p525_p13 = scmp.lt.s32.totalorder (%p1382_p12), %s524_s18, 2  ;;  %s1332_s29 = scalar_lea.vmem (%p1382_p12), %s1371_s5, %s803_s9  }
  0x51   : > { %828 = vmatprep.subr.bf16.mxu0 %v1149_v0  ;;  %282 = vst.msk [vmem:[#allocation2] sm:$0xff] %vm281_vm1, %v279_v4  ;;  %283 = vst.msk [vmem:[#allocation2 + $0x8] sm:$0xff] %vm281_vm1, %v280_v5  ;;  %848 = vmatprep.subr.bf16.mxu1 %v1149_v0  ;;  %v777_v32 = vld [vmem:[%s1370_s4] ss:$0 sm:$0xff] }
  0x54   : > { %829 = vmatpush3.bf16.msra.mxu0 %v979_v3  ;;  %849 = vmatpush3.bf16.msra.mxu1 %v987_v10 }
  0x55   : > { %830 = vmatprep.subr.bf16.mxu0 %v1149_v0  ;;  %850 = vmatprep.subr.bf16.mxu1 %v1149_v0 }
  0x58   : > { %831 = vmatpush3.bf16.msra.mxu0 %v980_v7  ;;  %851 = vmatpush3.bf16.msra.mxu1 %v988_v12  ;;  %v284_v16 = vld [vmem:[#allocation2] sm:$0xff]  ;;  %v285_v17 = vld [vmem:[#allocation2 + $0x8] sm:$0xff] }
  0x59   : > { %832 = vmatprep.subr.bf16.mxu0 %v1149_v0  ;;  %852 = vmatprep.subr.bf16.mxu1 %v1149_v0  ;;  %v286_v19 = vpack.c.bf16 %v285_v17, %v284_v16 }
  0x5c   : > { %833 = vmatpush3.bf16.msra.mxu0 %v981_v9  ;;  %853 = vmatpush3.bf16.msra.mxu1 %v989_v14 }
  0x5d   : > { %834 = vmatprep.subr.bf16.mxu0 %v1149_v0  ;;  %854 = vmatprep.subr.bf16.mxu1 %v1149_v0 }
  0x60   : > { %835 = vmatpush3.bf16.msra.mxu0 %v982_v11  ;;  %855 = vmatpush3.bf16.msra.mxu1 %v990_v18 }
  0x61   : > { %836 = vmatprep.subr.bf16.mxu0 %v1149_v0  ;;  %856 = vmatprep.subr.bf16.mxu1 %v1149_v0 }
  0x64   : > { %837 = vmatpush3.bf16.msra.mxu0 %v983_v13  ;;  %857 = vmatpush3.bf16.msra.mxu1 %v991_v20 }
  0x65   : > { %838 = vmatprep.subr.bf16.mxu0 %v1149_v0  ;;  %858 = vmatprep.subr.bf16.mxu1 %v1149_v0 }
  0x68   : > { %839 = vmatpush3.bf16.msra.mxu0 %v984_v15  ;;  %859 = vmatpush3.bf16.msra.mxu1 %v992_v21 }
  0x6b   : > { %841 = vmatmul.mubr.bf16.vlgmr.msra.gmra.mrb[0].mxu0 %v286_v19 }
 0x13e   : > { %v392_v23 = vpop.f32.mrb[0].mxu0 }
 0x13f   : > { %v393_v24 = vadd.f32 %v768_v22, %v392_v23  ;;  %v842_v25 = vpop.f32.mrb[1].mxu0 }
 0x140   : > { %v395_v26 = vpop.f32.mrb[2].mxu0 }
 0x141   : > { %v396_v27 = vadd.f32 %v768_v22, %v395_v26  ;;  %v843_v28 = vpop.f32.mrb[3].mxu0  ;;  %v399_v29 = vmax.f32 %v393_v24, 0.0 }
 0x143   : > { %v400_v30 = vmax.f32 %v396_v27, 0.0 }
 0x145   : > { %v401_v31 = vpack.c.bf16 %v400_v30, %v399_v29 }
 0x147   : > { %861 = vmatmul.mubr.bf16.vlgmr.msra.gmra.mrb[0].mxu1 %v401_v31 }
 0x219   : > { %522 = sbr.rel (!%p1382_p12) target bundleno = 593 (0x251), region = 52 }
 0x21a   : > { %v507_v33 = vpop.f32.mrb[0].mxu1 }
 0x21b   : > { %v508_v34 = vadd.f32 %v777_v32, %v507_v33  ;;  %v862_v35 = vpop.f32.mrb[1].mxu1 }
 0x21c   : > { %v510_v36 = vpop.f32.mrb[2].mxu1 }
 0x21d   : > { %514 = vst.msk [vmem:[%s1319_s8] sm:$0xff] %vm281_vm1, %v508_v34  ;;  %v511_v37 = vadd.f32 %v777_v32, %v510_v36  ;;  %v863_v38 = vpop.f32.mrb[3].mxu1 }
 0x21f   : > { %515 = vst.msk [vmem:[%s1319_s8 + $0x8] sm:$0xff] %vm281_vm1, %v511_v37 }
 0x220   : > { %s1387_s18 = smov (!%p525_p13, %s524_s18), 2 }
 0x221   : > { %s788_s12 = sshll.u32 %s1387_s18, 7 }
 0x222   : > { %p791_p0 = scmp.eq.s32.totalorder %s788_s12, 0 }
 0x223   : > { %s1338_s13 = sshrl.u32 (!%p791_p0), %s1387_s18, 1 }
 0x224   : > { %533 = sbr.rel (%p791_p0) target bundleno = 593 (0x251), region = 56  ;;  %p792_p1 = scmp.le.s32.totalorder (!%p791_p0), %s1338_s13, 0 }
 0x22b   : > { %695 = sbr.rel (%p792_p1) target bundleno = 572 (0x23c), region = 133  ;;  %s1113_s21 = smov (!%p792_p1), %s1332_s29  }
 0x22c   : > { %s1117_s26 = smov (!%p792_p1), %s1319_s8   ;;  %s1121_s30 = smov (!%p792_p1), 0  }
 0x22d   : > { %s1125_s27 = smov (!%p792_p1), 0  }
 0x232 LB: >> { %v597_v39 = vld [vmem:[%s1119_s26] sm:$0xff]  ;;  %v599_v40 = vld [vmem:[%s1119_s26 + $0x8] sm:$0xff]  ;;  %s601_s7 = sadd.s32 1, %s1123_s30  ;;  %s591_s27 = sadd.s32 1, %s1127_s27   ;;  %s1127_s27 = sphi %s1125_s27, %s591_s27   ;;  %s1123_s30 = sphi %s1121_s30, %s1122_s30   ;;  %s1119_s26 = sphi %s1117_s26, %s606_s26   ;;  %s1115_s21 = sphi %s1113_s21, %s607_s21  }
 0x233   : >> { %598 = vst [vmem:[%s1115_s21] sm:$0xff] %v597_v39  ;;  %600 = vst [vmem:[%s1115_s21 + $0x8] sm:$0xff] %v599_v40  ;;  %p602_p2 = scmp.ge.s32.totalorder %s601_s7, %s1338_s13  ;;  %p590_p3 = scmp.ge.s32.totalorder %s591_s27, %s1338_s13 }
 0x235   : >> { %s1389_s7 = smov (%p602_p2, %s601_s7), 0  ;;  %593 = sbr.rel (!%p590_p3) target bundleno = 562 (0x232), region = 139 }
 0x236   : >> { %s793_s14 = sshll.u32 %s1389_s7, 4  ;;  %s1122_s30 = smov %s1389_s7  }
 0x237   : >> { %s606_s26 = scalar_lea.vmem %s1319_s8, %s793_s14 [#allocation7]   ;;  %s607_s21 = scalar_lea.vmem %s1332_s29, %s793_s14  }
 0x23c PF: > { %s1348_s15 = sand.u32 1, %s1387_s18   ;;  %s804_s16 = sshll.u32 %s1338_s13, 4 }
 0x23d   : > { %s612_s17 = scalar_lea.vmem %s1319_s8, %s804_s16 [#allocation7]   ;;  %s614_s20 = scalar_lea.vmem %s1332_s29, %s804_s16  }
 0x23e   : > { %p798_p5 = scmp.le.s32.totalorder %s1348_s15, 0 }
 0x23f   : > { %s1129_s23 = smov (!%p798_p5), %s614_s20   ;;  %s1133_s24 = smov (!%p798_p5), %s612_s17  }
 0x240   : > { %709 = sbr.rel (%p798_p5) target bundleno = 593 (0x251), region = 144  ;;  %s1137_s28 = smov (!%p798_p5), 0  }
 0x241   : > { %s1141_s6 = smov (!%p798_p5), 0  }
 0x247 LB: >> { %v624_v41 = vld [vmem:[%s1135_s24] sm:$0xff]  ;;  %s626_s18 = sadd.s32 1, %s1139_s28  ;;  %s618_s6 = sadd.s32 1, %s1143_s6   ;;  %s1143_s6 = sphi %s1141_s6, %s618_s6   ;;  %s1139_s28 = sphi %s1137_s28, %s1138_s28   ;;  %s1135_s24 = sphi %s1133_s24, %s631_s24   ;;  %s1131_s23 = sphi %s1129_s23, %s632_s23  }
 0x248   : >> { %625 = vst [vmem:[%s1131_s23] sm:$0xff] %v624_v41  ;;  %p627_p8 = scmp.ge.s32.totalorder %s626_s18, %s1348_s15  ;;  %p617_p10 = scmp.ge.s32.totalorder %s618_s6, %s1348_s15 }
 0x24a   : >> { %s1391_s18 = smov (%p627_p8, %s626_s18), 0  ;;  %620 = sbr.rel (!%p617_p10) target bundleno = 583 (0x247), region = 150 }
 0x24b   : >> { %s799_s8 = sshll.u32 %s1391_s18, 3  ;;  %s1138_s28 = smov %s1391_s18  }
 0x24c   : >> { %s631_s24 = scalar_lea.vmem %s612_s17, %s799_s8 [#allocation7]   ;;  %s632_s23 = scalar_lea.vmem %s614_s20, %s799_s8  }
 0x251 PF: > { %p14_p4 = scmp.ge.s32.totalorder %s1196_s22, 4   ;;  %s1383_s18 = smov %s1107_s19 }
 0x252   : > { %s1384_s19 = smov %s1204_s25  ;;  %s1385_s20 = smov %s1196_s22 }
 0x253   :  { %16 = sbr.rel (!%p14_p4) target bundleno = 3 (0x3), region = 161 }
 0x25a   :  { %648 = vsyncpa [#allocation4], 1 }
 0x25b   :  { %650 = vsyncpa [#allocation4 + $0x1], 1 }
 0x25c   :  { %651 = vsyncpa [#allocation6], 1 }

</bundles_post_ra>
